<compile_context>
chip_gen: v7x
topology: tpu7x:2x2x1
jax: 0.10.0
libtpu: 0.0.40
codegen_flags: <defaults>
</compile_context>

<pallas_src>
import jax
import jax.numpy as jnp
from jax.experimental import pallas as pl
from jax.experimental.pallas import tpu as pltpu


def _round_up(a, b):
    return ((a + b - 1) // b) * b


def _vmem_budget_bytes():
    """Per-call VMEM budget, gated on the actual TPU generation."""
    cap = None
    try:
        cap = getattr(pltpu.get_tpu_info(), "vmem_capacity_bytes", None)
    except Exception:
        cap = None
    if not cap:
        cap = 64 * 1024 * 1024  # conservative default: v7x per-TensorCore VMEM
    # Leave headroom for compiler-internal scratch; cap at 96 MiB on v5e/v6e.
    return int(min(cap * 3 // 4, 96 * 1024 * 1024))


# ----------------------------- kernels ---------------------------------------

def _linear_kernel_resident_w(x_ref, w_ref, b_ref, o_ref):
    # Fast path: full-K x tile @ VMEM-resident (K, H) weight, bias add, store.
    o_ref[...] = (
        jnp.dot(x_ref[...], w_ref[...], preferred_element_type=jnp.float32)
        + b_ref[...].astype(jnp.float32)
    ).astype(o_ref.dtype)


def _linear_kernel_grid_f32out(x_ref, w_ref, b_ref, o_ref):
    # General path, f32 output: accumulate straight into the resident output
    # block (its index_map ignores k) -> no scratch, no zero-init pass.
    k = pl.program_id(2)
    part = jnp.dot(x_ref[...], w_ref[...], preferred_element_type=jnp.float32)

    @pl.when(k == 0)
    def _():
        o_ref[...] = part + b_ref[...].astype(jnp.float32)

    @pl.when(k > 0)
    def _():
        o_ref[...] += part


def _linear_kernel_grid_acc(x_ref, w_ref, b_ref, o_ref, acc_ref):
    # General path, narrow output dtype: f32 VMEM accumulator, one cast+store.
    k = pl.program_id(2)
    part = jnp.dot(x_ref[...], w_ref[...], preferred_element_type=jnp.float32)

    @pl.when(k == 0)
    def _():
        acc_ref[...] = part

    @pl.when(k > 0)
    def _():
        acc_ref[...] += part

    @pl.when(k == pl.num_programs(2) - 1)
    def _():
        o_ref[...] = (acc_ref[...] + b_ref[...].astype(jnp.float32)).astype(o_ref.dtype)


# ----------------------------- wrapper ----------------------------------------

def linear_adapter_forward(x, weight, bias, *,
                           weight_is_transposed=False,
                           compute_dtype=jnp.bfloat16,
                           tile_m=None, tile_n=None, tile_k=None,
                           force_general_path=False):
    """Forward of LinearAdapter: y = x @ W.T + b  (PyTorch nn.Linear semantics).

    x:      [..., input_size]
    weight: [hidden_size, input_size] (PyTorch layout), or
            [input_size, hidden_size] with weight_is_transposed=True
            (pre-transpose ONCE at parameter-load time: no per-call copy).
    bias:   [hidden_size]
    compute_dtype: dtype of the MXU operands (accumulation is always f32);
            None keeps the original dtypes (exact f32 path).
    """
    out_dtype = x.dtype
    *lead, K = x.shape
    M = 1
    for d in lead:
        M *= d

    w_kh = weight if weight_is_transposed else weight.T           # (K, H)
    H = w_kh.shape[1]
    b2d = bias.reshape(1, H)
    x2d = x.reshape(M, K)

    # Cast matmul operands down (never up); accumulation stays f32 on the MXU.
    if compute_dtype is not None:
        cd = jnp.dtype(compute_dtype)
        if jnp.dtype(x2d.dtype).itemsize > cd.itemsize:
            x2d = x2d.astype(cd)
        if jnp.dtype(w_kh.dtype).itemsize > cd.itemsize:
            w_kh = w_kh.astype(cd)

    x_item = jnp.dtype(x2d.dtype).itemsize
    w_item = jnp.dtype(w_kh.dtype).itemsize
    o_item = jnp.dtype(out_dtype).itemsize

    budget = _vmem_budget_bytes()

    # Generation-gated tile defaults (bigger on 128-MiB-VMEM v5e/v6e).
    big_vmem = budget >= 72 * 1024 * 1024
    if tile_m is None:
        tile_m = 512
    if tile_n is None:
        tile_n = 1024 if big_vmem else 512
    if tile_k is None:
        tile_k = 2048 if big_vmem else 1024

    # ---------- Fast path: weight + bias resident in VMEM, 1-D grid over M. ---
    w_resident = 2 * K * H * w_item              # double-buffer allocation bound
    if (not force_general_path) and w_resident <= min(budget // 2, 24 * 1024 * 1024):
        per_row = 2 * (K * x_item + H * o_item)  # double-buffered x + out rows
        tm_cap = (budget - w_resident - 2 * H * 4) // per_row
        tm = min(1024, _round_up(M, 8), (tm_cap // 8) * 8)
        if tm >= 8:
            if tm >= M:
                tm = M                           # single block covering full M
            grid = (pl.cdiv(M, tm),)             # ragged last M block is masked
            out = pl.pallas_call(
                _linear_kernel_resident_w,
                out_shape=jax.ShapeDtypeStruct((M, H), out_dtype),
                grid_spec=pltpu.PrefetchScalarGridSpec(
                    num_scalar_prefetch=0,
                    grid=grid,
                    in_specs=[
                        pl.BlockSpec((tm, K), lambda i: (i, 0)),   # stream x
                        pl.BlockSpec((K, H), lambda i: (0, 0)),    # resident W
                        pl.BlockSpec((1, H), lambda i: (0, 0)),    # resident bias
                    ],
                    out_specs=pl.BlockSpec((tm, H), lambda i: (i, 0)),
                ),
                compiler_params=pltpu.CompilerParams(
                    dimension_semantics=("parallel",),
                    vmem_limit_bytes=budget,
                ),
            )(x2d, w_kh, b2d)
            return out.reshape(*lead, H)

    # ---------- General path: 3-D (M, N, K) grid, K (reduction) last. ---------
    if M <= tile_m:
        tm = M                                                   # full-M block
    else:
        tm = _round_up(pl.cdiv(M, pl.cdiv(M, tile_m)), 8)        # balanced tile

    if H <= tile_n:
        tn = H                                                   # full-H block
    else:
        tn = _round_up(pl.cdiv(H, pl.cdiv(H, tile_n)), 128)      # lane-aligned

    if K <= tile_k:
        tk, Kp = K, K                                            # single K step
    else:
        tk = _round_up(pl.cdiv(K, pl.cdiv(K, tile_k)), 128)
        Kp = _round_up(K, tk)
        if Kp != K:
            # The K tail feeds the reduction -> must be explicit zeros.
            x2d = jnp.pad(x2d, ((0, 0), (0, Kp - K)))
            w_kh = jnp.pad(w_kh, ((0, Kp - K), (0, 0)))

    grid = (pl.cdiv(M, tm), pl.cdiv(H, tn), Kp // tk)

    in_specs = [
        pl.BlockSpec((tm, tk), lambda i, j, k: (i, k)),          # x tile
        pl.BlockSpec((tk, tn), lambda i, j, k: (k, j)),          # W (K,H) tile
        pl.BlockSpec((1, tn), lambda i, j, k: (0, j)),           # bias per N-tile
    ]
    out_spec = pl.BlockSpec((tm, tn), lambda i, j, k: (i, j))
    compiler_params = pltpu.CompilerParams(
        dimension_semantics=("parallel", "parallel", "arbitrary"),
        vmem_limit_bytes=budget,
    )

    if jnp.dtype(out_dtype) == jnp.float32:
        # Accumulate directly into the (resident) f32 output block -> no scratch.
        out = pl.pallas_call(
            _linear_kernel_grid_f32out,
            out_shape=jax.ShapeDtypeStruct((M, H), out_dtype),
            grid_spec=pltpu.PrefetchScalarGridSpec(
                num_scalar_prefetch=0, grid=grid,
                in_specs=in_specs, out_specs=out_spec),
            compiler_params=compiler_params,
        )(x2d, w_kh, b2d)
    else:
        out = pl.pallas_call(
            _linear_kernel_grid_acc,
            out_shape=jax.ShapeDtypeStruct((M, H), out_dtype),
            grid_spec=pltpu.PrefetchScalarGridSpec(
                num_scalar_prefetch=0, grid=grid,
                in_specs=in_specs, out_specs=out_spec,
                scratch_shapes=[pltpu.VMEM((tm, tn), jnp.float32)]),
            compiler_params=compiler_params,
        )(x2d, w_kh, b2d)

    return out.reshape(*lead, H)


if __name__ == "__main__":
    # Shapes consistent with the module: adapter on a [batch, seq, feat] stream.
    batch, seq, input_size, hidden_size = 2, 8, 32, 32

    key = jax.random.PRNGKey(0)
    kx, kw, kb = jax.random.split(key, 3)
    x = jax.random.normal(kx, (batch, seq, input_size), dtype=jnp.float32)
    # Deterministic synthetic parameters (PyTorch nn.Linear layout: W is (H, K)).
    weight = jax.random.normal(kw, (hidden_size, input_size), dtype=jnp.float32) * 0.1
    bias = jax.random.normal(kb, (hidden_size,), dtype=jnp.float32) * 0.1

    # Pre-transpose the weight ONCE (parameter-load time), as in real inference.
    w_kh = jnp.asarray(weight.T)

    ref = x @ weight.T + bias

    # Default path: bf16 MXU operands, f32 accumulation, weight-resident kernel.
    out = linear_adapter_forward(x, w_kh, bias, weight_is_transposed=True)
    jax.block_until_ready(out)
    assert out.shape == (batch, seq, hidden_size)
    assert out.dtype == x.dtype
    assert jnp.allclose(out, ref, atol=3e-2, rtol=3e-2), "bf16 fast path mismatch"

    # Exact f32 path (tight numerical check of the same kernel).
    out_f32 = linear_adapter_forward(x, w_kh, bias, weight_is_transposed=True,
                                     compute_dtype=None)
    jax.block_until_ready(out_f32)
    assert jnp.allclose(out_f32, ref, atol=1e-5, rtol=1e-5), "f32 fast path mismatch"

    # Exercise the general tiled (3-D grid) path at small-but-ragged shapes:
    # multi-step K reduction, zero-padded K tail, ragged M and N tails.
    b2, s2, k2, h2 = 2, 68, 200, 160
    x2 = jax.random.normal(kx, (b2, s2, k2), dtype=jnp.float32)
    w2 = jax.random.normal(kw, (h2, k2), dtype=jnp.float32) * 0.05
    bias2 = jax.random.normal(kb, (h2,), dtype=jnp.float32) * 0.05
    out2 = linear_adapter_forward(
        x2, w2, bias2, compute_dtype=None,
        tile_m=64, tile_n=128, tile_k=128, force_general_path=True)
    jax.block_until_ready(out2)
    ref2 = x2 @ w2.T + bias2
    assert out2.shape == (b2, s2, h2)
    assert jnp.allclose(out2, ref2, atol=1e-4, rtol=1e-4), "general path mismatch"

    print("KERNEL_OK")
</pallas_src>

<mosaic_0001>
module attributes {stable_mosaic.version = 11 : i64} {
  func.func @_linear_kernel_resident_w(%arg0: i32, %arg1: memref<16x32xbf16, #tpu.memory_space<vmem>>, %arg2: memref<32x32xbf16, #tpu.memory_space<vmem>>, %arg3: memref<1x32xf32, #tpu.memory_space<vmem>>, %arg4: memref<16x32xf32, #tpu.memory_space<vmem>>) attributes {dimension_semantics = [#tpu.dimension_semantics<parallel>], iteration_bounds = array<i64: 1>, scalar_prefetch = 0 : i64, scratch_operands = 0 : i64, tpu.core_type = #tpu.core_type<tc>, window_params = [{transform_indices = @transform_0, window_bounds = array<i64: 16, 32>}, {pipeline_mode = #tpu.pipeline_mode<synchronous>, transform_indices = @transform_1, window_bounds = array<i64: 32, 32>}, {pipeline_mode = #tpu.pipeline_mode<synchronous>, transform_indices = @transform_2, window_bounds = array<i64: 1, 32>}, {transform_indices = @transform_3, window_bounds = array<i64: 16, 32>}]} {
    %c0 = arith.constant 0 : index
    %c0_0 = arith.constant 0 : index
    %0 = vector.load %arg1[%c0, %c0_0] : memref<16x32xbf16, #tpu.memory_space<vmem>>, vector<16x32xbf16>
    %c0_1 = arith.constant 0 : index
    %c0_2 = arith.constant 0 : index
    %1 = vector.load %arg2[%c0_1, %c0_2] : memref<32x32xbf16, #tpu.memory_space<vmem>>, vector<32x32xbf16>
    %cst = arith.constant dense<0.000000e+00> : vector<16x32xf32>
    %2 = tpu.matmul %0, %1, %cst {dimension_numbers = #tpu.dot_dimension_numbers<[1], [0], [0], [1], [0, 0, 1, 1], [], []>} : vector<16x32xbf16>, vector<32x32xbf16>, vector<16x32xf32> -> vector<16x32xf32>
    %c0_3 = arith.constant 0 : index
    %c0_4 = arith.constant 0 : index
    %3 = vector.load %arg3[%c0_3, %c0_4] : memref<1x32xf32, #tpu.memory_space<vmem>>, vector<1x32xf32>
    %4 = vector.broadcast %3 : vector<1x32xf32> to vector<16x32xf32>
    %5 = arith.addf %2, %4 : vector<16x32xf32>
    %c0_5 = arith.constant 0 : index
    %c0_6 = arith.constant 0 : index
    %6 = vector.load %arg4[%c0_5, %c0_6] : memref<16x32xf32, #tpu.memory_space<vmem>>, vector<16x32xf32>
    tpu.vector_store %arg4[%c0_5, %c0_6], %5 {strides = array<i32>} : memref<16x32xf32, #tpu.memory_space<vmem>>, vector<16x32xf32>,
    return
  }
  func.func @transform_0(%arg0: i32) -> (i32, i32) {
    %c0_i32 = arith.constant 0 : i32
    %c0_i32_0 = arith.constant 0 : i32
    return %arg0, %c0_i32 : i32, i32
  }
  func.func @transform_1(%arg0: i32) -> (i32, i32) {
    %c0_i32 = arith.constant 0 : i32
    %c0_i32_0 = arith.constant 0 : i32
    %c0_i32_1 = arith.constant 0 : i32
    return %c0_i32, %c0_i32_0 : i32, i32
  }
  func.func @transform_2(%arg0: i32) -> (i32, i32) {
    %c0_i32 = arith.constant 0 : i32
    %c0_i32_0 = arith.constant 0 : i32
    %c0_i32_1 = arith.constant 0 : i32
    return %c0_i32, %c0_i32_0 : i32, i32
  }
  func.func @transform_3(%arg0: i32) -> (i32, i32) {
    %c0_i32 = arith.constant 0 : i32
    %c0_i32_0 = arith.constant 0 : i32
    return %arg0, %c0_i32 : i32, i32
  }
}

</mosaic_0001>

<bundles_post_ra>
// kernel: tpu_custom_call.1
= control target key start
LH: loop header
LB: loop body
LE: loop exit
PB: predicated region body
PF: predicated region fallthrough
CT: control target
= control target key end

     0   :  { %8 = vsyncpa [#allocation3], 0  ;;  %s307_s0 = inlined_call_operand.hbm [shape: bf16[16,32], index: 0, kind: input, shape index: {}]   ;;  %s308_s1 = inlined_call_operand.hbm [shape: bf16[32,32], index: 1, kind: input, shape index: {}]   ;;  %s309_s2 = inlined_call_operand.vmem [shape: f32[1,32], index: 2, kind: input, shape index: {}]   ;;  %s310_s3 = inlined_call_operand.hbm [shape: f32[16,32], index: 3, kind: output, shape index: {}]  }
   0x1   :  { %9 = vsyncpa [#allocation6], 0 }
   0x2   :  { %10 = vsyncpa [#allocation4], 0  ;;  %s239_s12 = smov [#allocation2]   ;;  %s167_s16 = scalar_lea.hbm %s307_s0, 128 }
   0x3   :  { %s16_s13 = sshll.u32 %s239_s12, 4  ;;  %p168_p0 = scmp.ne.s32.totalorder %s307_s0, %s167_s16  ;;  %s17_s13 = int_to_ptr.vmem [resolvable:$true] %s16_s13 }
   0x4   :  { %p171_p1 = scmp.lt.u32.totalorder %s167_s16, %s307_s0 }
   0x6   :  { %p173_p2 = pnand %p171_p1, %p168_p0 }
   0x8   :  { %176 = shalt.err (!%p173_p2)
}
   0x9   :  { %s177_s21 = scalar_lea.vmem %s17_s13, 128  ;;  %p182_p4 = scmp.lt.s32.totalorder %s17_s13, %s17_s13 }
   0xa   :  { %p178_p3 = scmp.ne.s32.totalorder %s17_s13, %s177_s21  ;;  %p183_p5 = scmp.lt.s32.totalorder %s177_s21, %s177_s21 }
   0xc   :  { %p184_p6 = por %p183_p5, %p182_p4 }
   0xe   :  { %p185_p7 = pnand %p184_p6, %p178_p3 }
  0x10   :  { %188 = shalt.err (!%p185_p7)
}
  0x11   :  { %s240_s22 = smov 64   ;;  %s241_s23 = smov 4  }
  0x12   :  { %22 = dma.hbm_to_vmem [thread:$0]  %s307_s0, 128, %s17_s13, [#allocation3], %s240_s22, %s240_s22, %s241_s23  }
  0x13   :  { %s242_s26 = smov [#allocation5]   ;;  %s189_s30 = scalar_lea.hbm %s308_s1, 256 }
  0x14   :  { %s28_s27 = sshll.u32 %s242_s26, 4  ;;  %p190_p8 = scmp.ne.s32.totalorder %s308_s1, %s189_s30  ;;  %s29_s27 = int_to_ptr.vmem [resolvable:$true] %s28_s27 }
  0x15   :  { %p193_p9 = scmp.lt.u32.totalorder %s189_s30, %s308_s1 }
  0x17   :  { %p195_p10 = pnand %p193_p9, %p190_p8 }
  0x19   :  { %198 = shalt.err (!%p195_p10)
}
  0x1a   :  { %s199_s8 = scalar_lea.vmem %s29_s27, 256  ;;  %p204_p12 = scmp.lt.s32.totalorder %s29_s27, %s29_s27 }
  0x1b   :  { %p200_p11 = scmp.ne.s32.totalorder %s29_s27, %s199_s8  ;;  %p205_p13 = scmp.lt.s32.totalorder %s199_s8, %s199_s8 }
  0x1d   :  { %p206_p0 = por %p205_p13, %p204_p12 }
  0x1f   :  { %p207_p1 = pnand %p206_p0, %p200_p11 }
  0x21   :  { %210 = shalt.err (!%p207_p1)
}
  0x22   :  { %34 = dma.hbm_to_vmem [thread:$0]  %s308_s1, 256, %s29_s27, [#allocation6], %s240_s22, %s240_s22, %s241_s23  }
  0x23   :  { %233 = dma.done.wait [#allocation3], 128  }
  0x24   :  { %234 = vsyncadd [#allocation3], 4294967168 }
  0x25   :  { %235 = dma.done.wait [#allocation6], 256  }
  0x26   :  { %236 = vsyncadd [#allocation6], 4294967040  ;;  %v243_v0 = vmov 0.0   ;;  %vm244_vm0 = vmmov 0   ;;  %v164_v1 = vld [vmem:[#allocation5] sm:$0xff]   ;;  %v165_v2 = vld [vmem:[#allocation5 + $0x8] sm:$0xff]  }
  0x27   :  { %147 = vmatprep.subr.bf16.mxu0 %v243_v0  ;;  %151 = vmatprep.mubr.msk.bf16.mxu0 %vm244_vm0, %v243_v0  ;;  %v166_v3 = vld [vmem:[#allocation2] sm:$0xff]   ;;  %vm74_vm1 = vcmask 261120   ;;  %s245_s1 = smov [#allocation7]  }
  0x28   :  { %148 = vmatpush3.bf16.msra.mxu0 %v164_v1  ;;  %v139_v4 = vld [vmem:[%s309_s2] ss:$0 sm:$0xff]  ;;  %s126_s12 = sshll.u32 %s245_s1, 4  ;;  %s127_s12 = int_to_ptr.vmem [resolvable:$true] %s126_s12 }
  0x29   :  { %149 = vmatprep.subr.bf16.mxu0 %v243_v0  ;;  %s211_s13 = scalar_lea.vmem %s127_s12, 256  ;;  %p216_p3 = scmp.lt.s32.totalorder %s127_s12, %s127_s12 }
  0x2a   :  { %p212_p2 = scmp.ne.s32.totalorder %s127_s12, %s211_s13  ;;  %p217_p4 = scmp.lt.s32.totalorder %s211_s13, %s211_s13 }
  0x2c   :  { %150 = vmatpush3.bf16.msra.mxu0 %v165_v2  ;;  %p218_p5 = por %p217_p4, %p216_p3 }
  0x2e   :  { %p219_p6 = pnand %p218_p5, %p212_p2 }
  0x2f   :  { %152 = vmatmul.mubr.msk.bf16.vlgmr.msra.gmra.mrb[0].mxu0 %vm74_vm1, %v166_v3 }
 0x102   :  { %v112_v5 = vpop.f32.mrb[0].mxu0 }
 0x103   :  { %v113_v6 = vadd.f32 %v139_v4, %v112_v5  ;;  %v153_v7 = vpop.f32.mrb[1].mxu0 }
 0x104   :  { %v115_v8 = vpop.f32.mrb[2].mxu0 }
 0x105   :  { %119 = vst.msk [vmem:[#allocation7] sm:$0xff] %vm74_vm1, %v113_v6  ;;  %v116_v9 = vadd.f32 %v139_v4, %v115_v8  ;;  %v154_v10 = vpop.f32.mrb[3].mxu0 }
 0x107   :  { %120 = vst.msk [vmem:[#allocation7 + $0x8] sm:$0xff] %vm74_vm1, %v116_v9 }
 0x108   :  { %222 = shalt.err (!%p219_p6)
}
 0x109   :  { %s223_s15 = scalar_lea.hbm %s310_s3, 256 }
 0x10a   :  { %p224_p7 = scmp.ne.s32.totalorder %s310_s3, %s223_s15  ;;  %p227_p8 = scmp.lt.u32.totalorder %s223_s15, %s310_s3 }
 0x10c   :  { %p229_p9 = pnand %p227_p8, %p224_p7 }
 0x10e   :  { %232 = shalt.err (!%p229_p9)
}
 0x10f   :  { %s246_s20 = smov 128   ;;  %s247_s21 = smov 8  }
 0x110   :  { %132 = dma.vmem_to_hbm [thread:$0]  %s127_s12, 256, %s310_s3, [#allocation4], %s246_s20, %s246_s20, %s247_s21  }
 0x111   :  { %237 = dma.done.wait [#allocation4], 256  }
 0x112   :  { %238 = vsyncadd [#allocation4], 4294967040 }
 0x113   :  { %136 = vsyncpa [#allocation3], 1 }
 0x114   :  { %137 = vsyncpa [#allocation6], 1 }
 0x115   :  { %138 = vsyncpa [#allocation4], 1 }

</bundles_post_ra>
